<compile_context>
chip_gen: v6e
topology: v6e:2x2x1
jax: 0.10.0
libtpu: 0.0.40
codegen_flags: <defaults>
</compile_context>

<pallas_src>
import functools
import math
from typing import NamedTuple

import jax
import jax.numpy as jnp
from jax.experimental import pallas as pl
from jax.experimental.pallas import tpu as pltpu


# Module defaults (used by the reference and the demo below).
DT = 0.05
TAU = DT
R = 0.1


class GLIFRHyper(NamedTuple):
    """Static (compile-time) folded hyper-parameters."""
    dt_over_tau: float = 1.0
    v_reset: float = 0.0
    i0: float = 0.0
    g_over_s: float = 1.0   # gamma / sigma_v


# ---------------------------------------------------------------------------
# Parameter preparation (hoisted out of the kernels — parameter-only work).
# ---------------------------------------------------------------------------
def prepare_params(params, *, dt=DT, tau=None, r=R, i0=0.0, v_reset=0.0,
                   gamma=1.0, sigma_v=1.0, lat_dtype=jnp.float32):
    """Precompute parameter transforms and fold the physical constants.

    Constants are derived from the actual (dt, tau, R, I0, v_reset, gamma,
    sigma_v) so non-default GLIFR configurations stay correct.
    `lat_dtype` controls the dtype of the recurrent-matmul weight (bf16 is a
    validated fast path; f32 is bit-tight against the reference).
    """
    if tau is None:
        tau = dt
    dt_over_tau = dt / tau
    km_dt = jax.nn.sigmoid(params["trans_k_m"])          # dt * k_m      (1, h)
    asc_k_dt = jax.nn.sigmoid(params["trans_asc_k"])     # dt * k_asc    (A, 1, h)
    asc_r = (1.0 - 2.0 * jax.nn.sigmoid(params["trans_asc_r"])) * dt_over_tau
    asc_amp = params["asc_amp"] * dt_over_tau

    # Stacked per-neuron parameter rows (one VMEM tile each instead of ~8).
    par_h = jnp.concatenate(
        [params["thresh"], km_dt * r, 1.0 - km_dt], axis=0)        # (3, h)
    par_asc = jnp.stack(
        [asc_r, asc_amp, 1.0 - asc_k_dt], axis=0)                  # (3, A, 1, h)

    return dict(
        weight_iv=params["weight_iv"].astype(jnp.float32),
        weight_lat=params["weight_lat"].astype(jnp.float32),
        weight_lat_mm=params["weight_lat"].astype(lat_dtype),
        par_h=par_h.astype(jnp.float32),
        par_asc=par_asc.astype(jnp.float32),
        hyper=GLIFRHyper(float(dt_over_tau), float(v_reset), float(i0),
                         float(gamma / sigma_v)),
    )


# ---------------------------------------------------------------------------
# Shared per-step update math (traced inside the kernels).
# ---------------------------------------------------------------------------
def _glifr_update(syn, firing, voltage, asc,
                  thresh, km_r, om_km, asc_r, asc_amp, om_asc_k, hyper):
    # after-spike currents:
    #   (asc*asc_r + asc_amp)*firing*(dt/tau) + (1 - dt*k_asc)*asc
    # (dt/tau already folded into asc_r / asc_amp)
    asc_new = (asc * asc_r + asc_amp) * firing[None] + om_asc_k * asc

    # membrane voltage:
    #   dt*k_m*R*(syn + sum(asc) + I0) + (1-dt*k_m)*v - dt/tau*f*(v - v_reset)
    total = syn + jnp.sum(asc_new, axis=0)
    if hyper.i0 != 0.0:
        total = total + hyper.i0
    leak = firing * (voltage - hyper.v_reset) if hyper.v_reset != 0.0 \
        else firing * voltage
    if hyper.dt_over_tau != 1.0:
        leak = hyper.dt_over_tau * leak
    v_new = km_r * total + om_km * voltage - leak

    # spike fn: sigmoid(gamma*(v - thresh)/sigma_v)
    act = v_new - thresh
    if hyper.g_over_s != 1.0:
        act = hyper.g_over_s * act
    f_new = jax.nn.sigmoid(act)
    return f_new, v_new, asc_new


# ---------------------------------------------------------------------------
# Single-step kernel (matches GLIFR.forward for one call).
# ---------------------------------------------------------------------------
def glifr_step_kernel(x_ref, fd_ref, f_ref, v_ref, asc_ref,
                      w_iv_ref, w_lat_ref, par_h_ref, par_asc_ref,
                      f_out_ref, v_out_ref, asc_out_ref, syn_out_ref,
                      *, hyper):
    syn = (jnp.dot(x_ref[...], w_iv_ref[...],
                   preferred_element_type=jnp.float32)
           + jnp.dot(fd_ref[...].astype(w_lat_ref.dtype), w_lat_ref[...],
                     preferred_element_type=jnp.float32))
    f_new, v_new, asc_new = _glifr_update(
        syn, f_ref[...], v_ref[...], asc_ref[...],
        par_h_ref[0:1], par_h_ref[1:2], par_h_ref[2:3],
        par_asc_ref[0], par_asc_ref[1], par_asc_ref[2], hyper)
    f_out_ref[...] = f_new
    v_out_ref[...] = v_new
    asc_out_ref[...] = asc_new
    syn_out_ref[...] = syn


@functools.partial(jax.jit, static_argnames=("hyper",))
def _glifr_step_call(x, firing_delayed, firing, voltage, ascurrent,
                     w_iv, w_lat, par_h, par_asc, *, hyper):
    n = x.shape[0]
    h = w_iv.shape[1]
    a = ascurrent.shape[0]
    out_shapes = (
        jax.ShapeDtypeStruct((n, h), jnp.float32),        # firing
        jax.ShapeDtypeStruct((n, h), jnp.float32),        # voltage
        jax.ShapeDtypeStruct((a, n, h), jnp.float32),     # ascurrent
        jax.ShapeDtypeStruct((n, h), jnp.float32),        # syncurrent
    )
    # No grid / no BlockSpecs: the whole (tiny) problem lives in VMEM.
    return pl.pallas_call(
        functools.partial(glifr_step_kernel, hyper=hyper),
        out_shape=out_shapes,
    )(x, firing_delayed, firing, voltage, ascurrent, w_iv, w_lat, par_h, par_asc)


def glifr_step(x, firing, voltage, ascurrent, syncurrent, prep,
               firing_delayed=None):
    """One GLIFR forward step. Returns (firing, voltage, ascurrent, syncurrent)."""
    del syncurrent  # previous syncurrent is not used by the update equations
    if firing_delayed is None:
        firing_delayed = firing
    return _glifr_step_call(
        x, firing_delayed, firing, voltage, ascurrent,
        prep["weight_iv"], prep["weight_lat_mm"],
        prep["par_h"], prep["par_asc"], hyper=prep["hyper"])


# ---------------------------------------------------------------------------
# Fused T-step kernel: grid=(T//Tb,), statically unrolled inner loop over Tb,
# weights + params VMEM-resident, recurrent state carried in VMEM scratch and
# in the constant-index-map asc output buffer.
# (firing_delayed defaults to the previous step's firing, as in the module.)
# ---------------------------------------------------------------------------
def glifr_seq_kernel(synx_ref,                       # (Tb, n, h)  x @ W_iv, t-block indexed
                     f0_ref, v0_ref, a0_ref,         # initial state (constant)
                     w_lat_ref, par_h_ref, par_asc_ref,   # resident params
                     f_seq_ref, v_seq_ref, syn_seq_ref,   # (Tb, n, h) t-block outputs
                     asc_out_ref,                    # (A, n, h) resident: asc carry + final
                     f_scr, v_scr,                   # VMEM scratch carries
                     *, block_t, hyper):
    @pl.when(pl.program_id(0) == 0)
    def _():
        f_scr[...] = f0_ref[...]
        v_scr[...] = v0_ref[...]
        asc_out_ref[...] = a0_ref[...]

    firing = f_scr[...]
    voltage = v_scr[...]
    asc = asc_out_ref[...]

    thresh = par_h_ref[0:1]
    km_r = par_h_ref[1:2]
    om_km = par_h_ref[2:3]
    asc_r = par_asc_ref[0]
    asc_amp = par_asc_ref[1]
    om_asc_k = par_asc_ref[2]
    w_lat = w_lat_ref[...]

    # Statically unrolled time loop over this block: the only per-step MXU
    # work left is the recurrent (n,h)@(h,h) lat matmul; the rest is a few
    # VPU ops plus one EUP sigmoid.
    for i in range(block_t):
        syn = synx_ref[i] + jnp.dot(firing.astype(w_lat.dtype), w_lat,
                                    preferred_element_type=jnp.float32)
        firing, voltage, asc = _glifr_update(
            syn, firing, voltage, asc,
            thresh, km_r, om_km, asc_r, asc_amp, om_asc_k, hyper)
        f_seq_ref[i] = firing
        v_seq_ref[i] = voltage
        syn_seq_ref[i] = syn

    # Carry state to the next grid step (one store per grid step, not per t).
    f_scr[...] = firing
    v_scr[...] = voltage
    asc_out_ref[...] = asc


def _pick_block_t(t_total, max_block_t):
    """Largest divisor of t_total that is <= max_block_t."""
    tb = max(1, min(t_total, int(max_block_t)))
    while t_total % tb:
        tb -= 1
    return tb


@functools.partial(jax.jit, static_argnames=("hyper", "max_block_t"))
def _glifr_seq_call(x_seq, firing0, voltage0, asc0,
                    w_iv, w_lat, par_h, par_asc, *, hyper, max_block_t):
    t_total, n, d_in = x_seq.shape
    h = w_iv.shape[1]
    a = asc0.shape[0]
    tb = _pick_block_t(t_total, max_block_t)

    # Hoisted input projection: one well-shaped (T*n, d_in)@(d_in, h) matmul
    # (plain XLA) instead of T tiny 8-row MXU passes inside the recurrence.
    syn_x = (x_seq.reshape(t_total * n, d_in) @ w_iv
             ).reshape(t_total, n, h).astype(jnp.float32)

    tmap = lambda t: (t, 0, 0)
    cmap2 = lambda t: (0, 0)
    cmap3 = lambda t: (0, 0, 0)
    cmap4 = lambda t: (0, 0, 0, 0)

    in_specs = [
        pl.BlockSpec((tb, n, h), tmap),        # syn_x (t-blocked)
        pl.BlockSpec((n, h), cmap2),           # firing0
        pl.BlockSpec((n, h), cmap2),           # voltage0
        pl.BlockSpec((a, n, h), cmap3),        # asc0
        pl.BlockSpec((h, h), cmap2),           # W_lat (VMEM resident)
        pl.BlockSpec((3, h), cmap2),           # stacked per-neuron params
        pl.BlockSpec((3, a, 1, h), cmap4),     # stacked asc params
    ]
    out_specs = (
        pl.BlockSpec((tb, n, h), tmap),        # firing per step
        pl.BlockSpec((tb, n, h), tmap),        # voltage per step
        pl.BlockSpec((tb, n, h), tmap),        # syncurrent per step
        pl.BlockSpec((a, n, h), cmap3),        # final ascurrent (resident carry)
    )
    out_shapes = (
        jax.ShapeDtypeStruct((t_total, n, h), jnp.float32),
        jax.ShapeDtypeStruct((t_total, n, h), jnp.float32),
        jax.ShapeDtypeStruct((t_total, n, h), jnp.float32),
        jax.ShapeDtypeStruct((a, n, h), jnp.float32),
    )
    return pl.pallas_call(
        functools.partial(glifr_seq_kernel, block_t=tb, hyper=hyper),
        grid=(t_total // tb,),
        in_specs=in_specs,
        out_specs=out_specs,
        out_shape=out_shapes,
        scratch_shapes=[pltpu.VMEM((n, h), jnp.float32),   # firing carry
                        pltpu.VMEM((n, h), jnp.float32)],  # voltage carry
        compiler_params=pltpu.CompilerParams(
            dimension_semantics=("arbitrary",)),           # time recurrence
    )(syn_x, firing0, voltage0, asc0, w_lat, par_h, par_asc)


def glifr_forward_seq(x_seq, firing0, voltage0, ascurrent0, prep,
                      max_block_t=16):
    """Run T GLIFR steps (firing_delayed = previous firing) in one pallas_call.

    x_seq: (T, n, input_size).  Returns
      (firing_seq (T,n,h), voltage_seq (T,n,h), syn_seq (T,n,h),
       asc_final (A,n,h)).
    """
    return _glifr_seq_call(
        x_seq, firing0, voltage0, ascurrent0,
        prep["weight_iv"], prep["weight_lat_mm"],
        prep["par_h"], prep["par_asc"],
        hyper=prep["hyper"], max_block_t=max_block_t)


# ---------------------------------------------------------------------------
# Deterministic init matching GLIFR.__init__ (hetinit=False) + JAX reference.
# ---------------------------------------------------------------------------
def init_glifr_params(key, input_size, hidden_size, num_ascs=2, dt=DT):
    k_iv, k_lat, k_ascr, k_ascamp = jax.random.split(key, 4)
    bound = math.sqrt(1.0 / hidden_size)
    weight_iv = jax.random.uniform(
        k_iv, (input_size, hidden_size), jnp.float32, -bound, bound)
    weight_lat = jax.random.uniform(
        k_lat, (hidden_size, hidden_size), jnp.float32, -bound, bound)

    thresh = jnp.ones((1, hidden_size), jnp.float32)
    trans_k_m = jnp.full(
        (1, hidden_size), math.log(0.05 * dt / (1.0 - 0.05 * dt)), jnp.float32)
    trans_asc_k = jnp.full(
        (num_ascs, 1, hidden_size), math.log(2.0 * dt / (1.0 - 2.0 * dt)),
        jnp.float32)
    asc_r = -0.01 + 0.02 * jax.random.uniform(
        k_ascr, (num_ascs, 1, hidden_size), jnp.float32)
    trans_asc_r = jnp.log((1.0 - asc_r) / (1.0 + asc_r))
    asc_amp = -0.01 + 0.02 * jax.random.uniform(
        k_ascamp, (num_ascs, 1, hidden_size), jnp.float32)

    return dict(
        weight_iv=weight_iv, weight_lat=weight_lat, thresh=thresh,
        trans_k_m=trans_k_m, trans_asc_k=trans_asc_k,
        trans_asc_r=trans_asc_r, asc_amp=asc_amp,
    )


def glifr_forward_ref(x, firing, voltage, ascurrent, syncurrent, params,
                      firing_delayed=None):
    """Plain-JAX reference matching the PyTorch forward (module defaults)."""
    del syncurrent
    if firing_delayed is None:
        firing_delayed = firing
    syn = x @ params["weight_iv"] + firing_delayed @ params["weight_lat"]
    asc_r = 1.0 - 2.0 * jax.nn.sigmoid(params["trans_asc_r"])
    k_asc = jax.nn.sigmoid(params["trans_asc_k"]) / DT
    asc = ((ascurrent * asc_r + params["asc_amp"]) * firing * (DT / TAU)
           + (1.0 - DT * k_asc) * ascurrent)
    k_m = jax.nn.sigmoid(params["trans_k_m"]) / DT
    v = (DT * k_m * R * (syn + jnp.sum(asc, axis=0) + 0.0)
         + (1.0 - DT * k_m) * voltage
         - DT / TAU * firing * (voltage - 0.0))
    f = jax.nn.sigmoid(1.0 * (v - params["thresh"]) / 1.0)
    return f, v, asc, syn


def glifr_seq_ref(x_seq, firing0, voltage0, asc0, params):
    def body(carry, x_t):
        f, v, a = carry
        f, v, a, syn = glifr_forward_ref(x_t, f, v, a, None, params)
        return (f, v, a), (f, v, syn)
    (f, v, a), (f_seq, v_seq, syn_seq) = jax.lax.scan(
        body, (firing0, voltage0, asc0), x_seq)
    return f_seq, v_seq, syn_seq, a


# ---------------------------------------------------------------------------
if __name__ == "__main__":
    batch = 8
    input_size = 64
    hidden_size = 128
    num_ascs = 2
    T = 16

    key = jax.random.PRNGKey(0)
    k_params, k_x, k_f, k_v, k_asc, k_xseq = jax.random.split(key, 6)

    params = init_glifr_params(k_params, input_size, hidden_size, num_ascs)
    prep = prepare_params(params)                                 # exact f32 path
    prep_bf16 = prepare_params(params, lat_dtype=jnp.bfloat16)    # fast lat matmul

    # --- single step --------------------------------------------------------
    x = jax.random.normal(k_x, (batch, input_size), jnp.float32)
    firing = jax.nn.sigmoid(
        jax.random.normal(k_f, (batch, hidden_size), jnp.float32))
    voltage = 0.1 * jax.random.normal(k_v, (batch, hidden_size), jnp.float32)
    ascurrent = 0.01 * jax.random.normal(
        k_asc, (num_ascs, batch, hidden_size), jnp.float32)
    syncurrent = jnp.zeros((batch, hidden_size), jnp.float32)

    out = glifr_step(x, firing, voltage, ascurrent, syncurrent, prep)
    out = jax.block_until_ready(out)
    ref = glifr_forward_ref(x, firing, voltage, ascurrent, syncurrent, params)
    for o, r in zip(out, ref):
        assert o.shape == r.shape and o.dtype == r.dtype
        assert float(jnp.max(jnp.abs(o - r))) < 5e-5

    # --- fused time loop (f32, whole sequence in one grid step) -------------
    x_seq = jax.random.normal(k_xseq, (T, batch, input_size), jnp.float32)
    f_ref, v_ref, syn_ref, a_ref = glifr_seq_ref(
        x_seq, firing, voltage, ascurrent, params)

    f_seq, v_seq, syn_seq, asc_final = jax.block_until_ready(
        glifr_forward_seq(x_seq, firing, voltage, ascurrent, prep))
    assert float(jnp.max(jnp.abs(f_seq - f_ref))) < 1e-4
    assert float(jnp.max(jnp.abs(v_seq - v_ref))) < 1e-4
    assert float(jnp.max(jnp.abs(syn_seq - syn_ref))) < 1e-4
    assert float(jnp.max(jnp.abs(asc_final - a_ref))) < 1e-4

    # --- same, but exercising the multi-block grid carry (Tb=8 -> grid=(2,)) -
    f_seq2, v_seq2, syn_seq2, asc_final2 = jax.block_until_ready(
        glifr_forward_seq(x_seq, firing, voltage, ascurrent, prep,
                          max_block_t=8))
    assert float(jnp.max(jnp.abs(f_seq2 - f_ref))) < 1e-4
    assert float(jnp.max(jnp.abs(v_seq2 - v_ref))) < 1e-4
    assert float(jnp.max(jnp.abs(syn_seq2 - syn_ref))) < 1e-4
    assert float(jnp.max(jnp.abs(asc_final2 - a_ref))) < 1e-4

    # --- bf16 recurrent-matmul fast path (looser tolerance vs f32 reference) -
    f_seq_b, v_seq_b, syn_seq_b, asc_final_b = jax.block_until_ready(
        glifr_forward_seq(x_seq, firing, voltage, ascurrent, prep_bf16))
    assert float(jnp.max(jnp.abs(f_seq_b - f_ref))) < 2e-2
    assert float(jnp.max(jnp.abs(v_seq_b - v_ref))) < 2e-2
    assert float(jnp.max(jnp.abs(syn_seq_b - syn_ref))) < 2e-2
    assert float(jnp.max(jnp.abs(asc_final_b - a_ref))) < 2e-2

    print("KERNEL_OK")
</pallas_src>

<mosaic_0001>
module attributes {stable_mosaic.version = 11 : i64} {
  func.func @glifr_step_kernel(%arg0: memref<8x64xf32, #tpu.memory_space<vmem>>, %arg1: memref<8x128xf32, #tpu.memory_space<vmem>>, %arg2: memref<8x128xf32, #tpu.memory_space<vmem>>, %arg3: memref<8x128xf32, #tpu.memory_space<vmem>>, %arg4: memref<2x8x128xf32, #tpu.memory_space<vmem>>, %arg5: memref<64x128xf32, #tpu.memory_space<vmem>>, %arg6: memref<128x128xf32, #tpu.memory_space<vmem>>, %arg7: memref<3x128xf32, #tpu.memory_space<vmem>>, %arg8: memref<3x2x1x128xf32, #tpu.memory_space<vmem>>, %arg9: memref<8x128xf32, #tpu.memory_space<vmem>>, %arg10: memref<8x128xf32, #tpu.memory_space<vmem>>, %arg11: memref<2x8x128xf32, #tpu.memory_space<vmem>>, %arg12: memref<8x128xf32, #tpu.memory_space<vmem>>) attributes {dimension_semantics = [], scalar_prefetch = 0 : i64, scratch_operands = 0 : i64, tpu.core_type = #tpu.core_type<tc>} {
    %c0 = arith.constant 0 : index
    %c0_0 = arith.constant 0 : index
    %0 = vector.load %arg0[%c0, %c0_0] : memref<8x64xf32, #tpu.memory_space<vmem>>, vector<8x64xf32>
    %c0_1 = arith.constant 0 : index
    %c0_2 = arith.constant 0 : index
    %1 = vector.load %arg5[%c0_1, %c0_2] : memref<64x128xf32, #tpu.memory_space<vmem>>, vector<64x128xf32>
    %cst = arith.constant dense<0.000000e+00> : vector<8x128xf32>
    %2 = tpu.matmul %0, %1, %cst {dimension_numbers = #tpu.dot_dimension_numbers<[1], [0], [0], [1], [0, 0, 1, 1], [], []>} : vector<8x64xf32>, vector<64x128xf32>, vector<8x128xf32> -> vector<8x128xf32>
    %c0_3 = arith.constant 0 : index
    %c0_4 = arith.constant 0 : index
    %3 = vector.load %arg1[%c0_3, %c0_4] : memref<8x128xf32, #tpu.memory_space<vmem>>, vector<8x128xf32>
    %c0_5 = arith.constant 0 : index
    %c0_6 = arith.constant 0 : index
    %4 = vector.load %arg6[%c0_5, %c0_6] : memref<128x128xf32, #tpu.memory_space<vmem>>, vector<128x128xf32>
    %cst_7 = arith.constant dense<0.000000e+00> : vector<8x128xf32>
    %5 = tpu.matmul %3, %4, %cst_7 {dimension_numbers = #tpu.dot_dimension_numbers<[1], [0], [0], [1], [0, 0, 1, 1], [], []>} : vector<8x128xf32>, vector<128x128xf32>, vector<8x128xf32> -> vector<8x128xf32>
    %6 = arith.addf %2, %5 : vector<8x128xf32>
    %c0_8 = arith.constant 0 : index
    %c0_9 = arith.constant 0 : index
    %7 = vector.load %arg2[%c0_8, %c0_9] : memref<8x128xf32, #tpu.memory_space<vmem>>, vector<8x128xf32>
    %c0_10 = arith.constant 0 : index
    %c0_11 = arith.constant 0 : index
    %8 = vector.load %arg3[%c0_10, %c0_11] : memref<8x128xf32, #tpu.memory_space<vmem>>, vector<8x128xf32>
    %c0_12 = arith.constant 0 : index
    %c0_13 = arith.constant 0 : index
    %c0_14 = arith.constant 0 : index
    %9 = vector.load %arg4[%c0_12, %c0_13, %c0_14] : memref<2x8x128xf32, #tpu.memory_space<vmem>>, vector<2x8x128xf32>
    %c0_15 = arith.constant 0 : index
    %c0_16 = arith.constant 0 : index
    %10 = vector.load %arg7[%c0_15, %c0_16] : memref<3x128xf32, #tpu.memory_space<vmem>>, vector<1x128xf32>
    %c1 = arith.constant 1 : index
    %c0_17 = arith.constant 0 : index
    %11 = vector.load %arg7[%c1, %c0_17] : memref<3x128xf32, #tpu.memory_space<vmem>>, vector<1x128xf32>
    %c2 = arith.constant 2 : index
    %c0_18 = arith.constant 0 : index
    %12 = vector.load %arg7[%c2, %c0_18] : memref<3x128xf32, #tpu.memory_space<vmem>>, vector<1x128xf32>
    %c0_19 = arith.constant 0 : index
    %c0_20 = arith.constant 0 : index
    %c0_21 = arith.constant 0 : index
    %c0_22 = arith.constant 0 : index
    %13 = vector.load %arg8[%c0_19, %c0_20, %c0_21, %c0_22] : memref<3x2x1x128xf32, #tpu.memory_space<vmem>>, vector<1x2x1x128xf32>
    %14 = vector.shape_cast %13 : vector<1x2x1x128xf32> to vector<2x1x128xf32>
    %c1_23 = arith.constant 1 : index
    %c0_24 = arith.constant 0 : index
    %c0_25 = arith.constant 0 : index
    %c0_26 = arith.constant 0 : index
    %15 = vector.load %arg8[%c1_23, %c0_24, %c0_25, %c0_26] : memref<3x2x1x128xf32, #tpu.memory_space<vmem>>, vector<1x2x1x128xf32>
    %16 = vector.shape_cast %15 : vector<1x2x1x128xf32> to vector<2x1x128xf32>
    %c2_27 = arith.constant 2 : index
    %c0_28 = arith.constant 0 : index
    %c0_29 = arith.constant 0 : index
    %c0_30 = arith.constant 0 : index
    %17 = vector.load %arg8[%c2_27, %c0_28, %c0_29, %c0_30] : memref<3x2x1x128xf32, #tpu.memory_space<vmem>>, vector<1x2x1x128xf32>
    %18 = vector.shape_cast %17 : vector<1x2x1x128xf32> to vector<2x1x128xf32>
    %19 = vector.broadcast %14 : vector<2x1x128xf32> to vector<2x8x128xf32>
    %20 = arith.mulf %9, %19 : vector<2x8x128xf32>
    %21 = vector.broadcast %16 : vector<2x1x128xf32> to vector<2x8x128xf32>
    %22 = arith.addf %20, %21 : vector<2x8x128xf32>
    %23 = vector.shape_cast %7 : vector<8x128xf32> to vector<1x8x128xf32>
    %24 = vector.broadcast %23 : vector<1x8x128xf32> to vector<2x8x128xf32>
    %25 = arith.mulf %22, %24 : vector<2x8x128xf32>
    %26 = vector.broadcast %18 : vector<2x1x128xf32> to vector<2x8x128xf32>
    %27 = arith.mulf %26, %9 : vector<2x8x128xf32>
    %28 = arith.addf %25, %27 : vector<2x8x128xf32>
    %cst_31 = arith.constant dense<0.000000e+00> : vector<8x128xf32>
    %29 = vector.multi_reduction <add>, %28, %cst_31 [0] : vector<2x8x128xf32> to vector<8x128xf32>
    %30 = arith.addf %6, %29 : vector<8x128xf32>
    %31 = arith.mulf %7, %8 : vector<8x128xf32>
    %32 = vector.broadcast %11 : vector<1x128xf32> to vector<8x128xf32>
    %33 = arith.mulf %32, %30 : vector<8x128xf32>
    %34 = vector.broadcast %12 : vector<1x128xf32> to vector<8x128xf32>
    %35 = arith.mulf %34, %8 : vector<8x128xf32>
    %36 = arith.addf %33, %35 : vector<8x128xf32>
    %37 = arith.subf %36, %31 : vector<8x128xf32>
    %38 = vector.broadcast %10 : vector<1x128xf32> to vector<8x128xf32>
    %39 = arith.subf %37, %38 : vector<8x128xf32>
    %40 = arith.negf %39 : vector<8x128xf32>
    %41 = math.exp %40 : vector<8x128xf32>
    %cst_32 = arith.constant 1.000000e+00 : f32
    %42 = vector.broadcast %cst_32 : f32 to vector<8x128xf32>
    %43 = arith.addf %42, %41 : vector<8x128xf32>
    %44 = arith.divf %42, %43 : vector<8x128xf32>
    %c0_33 = arith.constant 0 : index
    %c0_34 = arith.constant 0 : index
    %45 = vector.load %arg9[%c0_33, %c0_34] : memref<8x128xf32, #tpu.memory_space<vmem>>, vector<8x128xf32>
    tpu.vector_store %arg9[%c0_33, %c0_34], %44 {strides = array<i32>} : memref<8x128xf32, #tpu.memory_space<vmem>>, vector<8x128xf32>,
    %c0_35 = arith.constant 0 : index
    %c0_36 = arith.constant 0 : index
    %46 = vector.load %arg10[%c0_35, %c0_36] : memref<8x128xf32, #tpu.memory_space<vmem>>, vector<8x128xf32>
    tpu.vector_store %arg10[%c0_35, %c0_36], %37 {strides = array<i32>} : memref<8x128xf32, #tpu.memory_space<vmem>>, vector<8x128xf32>,
    %c0_37 = arith.constant 0 : index
    %c0_38 = arith.constant 0 : index
    %c0_39 = arith.constant 0 : index
    %47 = vector.load %arg11[%c0_37, %c0_38, %c0_39] : memref<2x8x128xf32, #tpu.memory_space<vmem>>, vector<2x8x128xf32>
    tpu.vector_store %arg11[%c0_37, %c0_38, %c0_39], %28 {strides = array<i32>} : memref<2x8x128xf32, #tpu.memory_space<vmem>>, vector<2x8x128xf32>,
    %c0_40 = arith.constant 0 : index
    %c0_41 = arith.constant 0 : index
    %48 = vector.load %arg12[%c0_40, %c0_41] : memref<8x128xf32, #tpu.memory_space<vmem>>, vector<8x128xf32>
    tpu.vector_store %arg12[%c0_40, %c0_41], %6 {strides = array<i32>} : memref<8x128xf32, #tpu.memory_space<vmem>>, vector<8x128xf32>,
    return
  }
}

</mosaic_0001>

<bundles_post_ra>
// kernel: _glifr_step_call.1
= control target key start
LH: loop header
LB: loop body
LE: loop exit
PB: predicated region body
PF: predicated region fallthrough
CT: control target
= control target key end

     0   :  { %18 = vsyncpa [#allocation3], 0  ;;  %s975_s0 = inlined_call_operand.hbm [shape: f32[8,64], index: 0, kind: input, shape index: {}]   ;;  %s976_s1 = inlined_call_operand.hbm [shape: f32[8,128], index: 1, kind: input, shape index: {}]   ;;  %s977_s2 = inlined_call_operand.hbm [shape: f32[8,128], index: 2, kind: input, shape index: {}]   ;;  %s978_s3 = inlined_call_operand.hbm [shape: f32[8,128], index: 3, kind: input, shape index: {}]   ;;  %s979_s4 = inlined_call_operand.hbm [shape: f32[2,8,128], index: 4, kind: input, shape index: {}]   ;;  %s980_s5 = inlined_call_operand.hbm [shape: f32[64,128], index: 5, kind: input, shape index: {}]   ;;  %s981_s6 = inlined_call_operand.hbm [shape: f32[128,128], index: 6, kind: input, shape index: {}]   ;;  %s982_s7 = inlined_call_operand.vmem [shape: f32[3,128], index: 7, kind: input, shape index: {}]   ;;  %s983_s8 = inlined_call_operand.vmem [shape: f32[3,2,1,128], index: 8, kind: input, shape index: {}]   ;;  %s984_s9 = inlined_call_operand.hbm [shape: f32[8,128], index: 9, kind: output, shape index: {0}]   ;;  %s985_s10 = inlined_call_operand.hbm [shape: f32[8,128], index: 10, kind: output, shape index: {1}]   ;;  %s986_s11 = inlined_call_operand.hbm [shape: f32[2,8,128], index: 11, kind: output, shape index: {2}]   ;;  %s987_s12 = inlined_call_operand.hbm [shape: f32[8,128], index: 12, kind: output, shape index: {3}]  }
   0x1   :  { %19 = vsyncpa [#allocation6], 0 }
   0x2   :  { %20 = vsyncpa [#allocation9], 0 }
   0x3   :  { %21 = vsyncpa [#allocation12], 0 }
   0x4   :  { %22 = vsyncpa [#allocation4], 0 }
   0x5   :  { %23 = vsyncpa [#allocation16], 0 }
   0x6   :  { %24 = vsyncpa [#allocation19], 0  ;;  %s797_s21 = smov [#allocation5]   ;;  %s798_s23 = smov [#allocation8]  }
   0x7   :  { %s41_s22 = sshll.u32 %s797_s21, 4  ;;  %s61_s24 = sshll.u32 %s798_s23, 4  ;;  %s42_s22 = int_to_ptr.vmem [resolvable:$true] %s41_s22  ;;  %s62_s24 = int_to_ptr.vmem [resolvable:$true] %s61_s24 }
   0x8   :  { %s571_s25 = scalar_lea.vmem %s42_s22, 128  ;;  %p576_p1 = scmp.lt.s32.totalorder %s42_s22, %s42_s22 }
   0x9   :  { %p572_p0 = scmp.ne.s32.totalorder %s42_s22, %s571_s25  ;;  %p577_p2 = scmp.lt.s32.totalorder %s571_s25, %s571_s25 }
   0xb   :  { %p578_p3 = por %p577_p2, %p576_p1 }
   0xd   :  { %p579_p4 = pnand %p578_p3, %p572_p0 }
   0xf   :  { %582 = shalt.err (!%p579_p4)
}
  0x10   :  { %44 = dma.hbm_to_vmem [thread:$0]  %s976_s1, 128, %s42_s22, [#allocation6]  }
  0x11   :  { %s591_s28 = scalar_lea.vmem %s62_s24, 128  ;;  %p596_p6 = scmp.lt.s32.totalorder %s62_s24, %s62_s24 }
  0x12   :  { %p592_p5 = scmp.ne.s32.totalorder %s62_s24, %s591_s28  ;;  %p597_p7 = scmp.lt.s32.totalorder %s591_s28, %s591_s28 }
  0x14   :  { %p598_p8 = por %p597_p7, %p596_p6 }
  0x16   :  { %p599_p9 = pnand %p598_p8, %p592_p5 }
  0x18   :  { %602 = shalt.err (!%p599_p9)
}
  0x19   :  { %64 = dma.hbm_to_vmem [thread:$0]  %s978_s3, 128, %s62_s24, [#allocation9]  }
  0x1a   :  { %s799_s13 = smov [#allocation11]   ;;  %s800_s15 = smov [#allocation2]  }
  0x1b   :  { %s82_s14 = sshll.u32 %s799_s13, 4  ;;  %s31_s16 = sshll.u32 %s800_s15, 4  ;;  %s83_s14 = int_to_ptr.vmem [resolvable:$true] %s82_s14  ;;  %s32_s16 = int_to_ptr.vmem [resolvable:$true] %s31_s16 }
  0x1c   :  { %s611_s17 = scalar_lea.vmem %s83_s14, 1024  ;;  %p616_p11 = scmp.lt.s32.totalorder %s83_s14, %s83_s14 }
  0x1d   :  { %p612_p10 = scmp.ne.s32.totalorder %s83_s14, %s611_s17  ;;  %p617_p12 = scmp.lt.s32.totalorder %s611_s17, %s611_s17 }
  0x1f   :  { %p618_p13 = por %p617_p12, %p616_p11 }
  0x21   :  { %p619_p0 = pnand %p618_p13, %p612_p10 }
  0x23   :  { %622 = shalt.err (!%p619_p0)
}
  0x24   :  { %s801_s1 = smov 128   ;;  %s802_s18 = smov 8  }
  0x25   :  { %88 = dma.hbm_to_vmem [thread:$0]  %s980_s5, 1024, %s83_s14, [#allocation12], %s801_s1, %s801_s1, %s802_s18  }
  0x26   :  { %s631_s20 = scalar_lea.vmem %s32_s16, 128  ;;  %p636_p2 = scmp.lt.s32.totalorder %s32_s16, %s32_s16 }
  0x27   :  { %p632_p1 = scmp.ne.s32.totalorder %s32_s16, %s631_s20  ;;  %p637_p3 = scmp.lt.s32.totalorder %s631_s20, %s631_s20 }
  0x29   :  { %p638_p4 = por %p637_p3, %p636_p2 }
  0x2b   :  { %p639_p5 = pnand %p638_p4, %p632_p1 }
  0x2d   :  { %642 = shalt.err (!%p639_p5)
}
  0x2e   :  { %34 = dma.hbm_to_vmem [thread:$0]  %s975_s0, 128, %s32_s16, [#allocation3]  }
  0x2f   :  { %s803_s23 = smov [#allocation7]   ;;  %s804_s25 = smov [#allocation10]  }
  0x30   :  { %s51_s24 = sshll.u32 %s803_s23, 4  ;;  %s70_s26 = sshll.u32 %s804_s25, 4  ;;  %s52_s24 = int_to_ptr.vmem [resolvable:$true] %s51_s24  ;;  %s71_s26 = int_to_ptr.vmem [resolvable:$true] %s70_s26 }
  0x31   :  { %s651_s27 = scalar_lea.vmem %s52_s24, 128  ;;  %p656_p7 = scmp.lt.s32.totalorder %s52_s24, %s52_s24 }
  0x32   :  { %p652_p6 = scmp.ne.s32.totalorder %s52_s24, %s651_s27  ;;  %p657_p8 = scmp.lt.s32.totalorder %s651_s27, %s651_s27 }
  0x34   :  { %p658_p9 = por %p657_p8, %p656_p7 }
  0x36   :  { %p659_p10 = pnand %p658_p9, %p652_p6 }
  0x38   :  { %662 = shalt.err (!%p659_p10)
}
  0x39   :  { %54 = dma.hbm_to_vmem [thread:$0]  %s977_s2, 128, %s52_s24, [#allocation6]  }
  0x3a   :  { %s671_s29 = scalar_lea.vmem %s71_s26, 256  ;;  %p676_p12 = scmp.lt.s32.totalorder %s71_s26, %s71_s26 }
  0x3b   :  { %p672_p11 = scmp.ne.s32.totalorder %s71_s26, %s671_s29  ;;  %p677_p13 = scmp.lt.s32.totalorder %s671_s29, %s671_s29 }
  0x3d   :  { %p678_p0 = por %p677_p13, %p676_p12 }
  0x3f   :  { %p679_p1 = pnand %p678_p0, %p672_p11 }
  0x41   :  { %682 = shalt.err (!%p679_p1)
}
  0x42   :  { %76 = dma.hbm_to_vmem [thread:$0]  %s979_s4, 256, %s71_s26, [#allocation9], %s801_s1, %s801_s1, %s802_s18  }
  0x43   :  { %s805_s13 = smov [#allocation13]  }
  0x44   :  { %s94_s14 = sshll.u32 %s805_s13, 4  ;;  %s95_s14 = int_to_ptr.vmem [resolvable:$true] %s94_s14 }
  0x45   :  { %s691_s15 = scalar_lea.vmem %s95_s14, 2048  ;;  %p696_p3 = scmp.lt.s32.totalorder %s95_s14, %s95_s14 }
  0x46   :  { %p692_p2 = scmp.ne.s32.totalorder %s95_s14, %s691_s15  ;;  %p697_p4 = scmp.lt.s32.totalorder %s691_s15, %s691_s15 }
  0x48   :  { %p698_p5 = por %p697_p4, %p696_p3 }
  0x4a   :  { %p699_p6 = pnand %p698_p5, %p692_p2 }
  0x4c   :  { %702 = shalt.err (!%p699_p6)
}
  0x4d   :  { %100 = dma.hbm_to_vmem [thread:$0]  %s981_s6, 2048, %s95_s14, [#allocation12], %s801_s1, %s801_s1, %s802_s18  }
  0x4e   :  { %783 = dma.done.wait [#allocation3], 128  }
  0x4f   :  { %784 = vsyncadd [#allocation3], 4294967168 }
  0x50   :  { %785 = dma.done.wait [#allocation6], 256  }
  0x51   :  { %786 = vsyncadd [#allocation6], 4294967040 }
  0x52   :  { %787 = dma.done.wait [#allocation9], 384  }
  0x53   :  { %788 = vsyncadd [#allocation9], 4294966912 }
  0x54   :  { %789 = dma.done.wait [#allocation12], 3072  }
  0x55   :  { %790 = vsyncadd [#allocation12], 4294964224  ;;  %v806_v0 = vmov 0.0   ;;  %vm807_vm0 = vmmov 0   ;;  %v151_v1 = vld [vmem:[#allocation13 + $0x78] sm:$0xff]  ;;  %v150_v2 = vld [vmem:[#allocation13 + $0x70] sm:$0xff] }
  0x56   :  { %490 = vmatprep.subr.mxu0 %v806_v0  ;;  %525 = vmatprep.subr.mxu1 %v806_v0  ;;  %v149_v3 = vld [vmem:[#allocation13 + $0x68] sm:$0xff]  ;;  %v134_v4 = vld [vmem:[#allocation11 + $0x38] sm:$0xff]  ;;  %v133_v5 = vld [vmem:[#allocation11 + $0x30] sm:$0xff]  ;;  %vm222_vm1 = vcmask 523264   ;;  %s808_s27 = smov [#allocation18]  }
  0x57   :  { %541 = vmatprep.mubr.msk.f32.mxu1 %vm807_vm0, %v806_v0  ;;  %522 = vmatprep.mubr.msk.f32.mxu0 %vm807_vm0, %v806_v0  ;;  %v148_v6 = vld [vmem:[#allocation13 + $0x60] sm:$0xff]  ;;  %v132_v7 = vld [vmem:[#allocation11 + $0x28] sm:$0xff]  ;;  %v147_v8 = vld [vmem:[#allocation13 + $0x58] sm:$0xff]  ;;  %s426_s5 = sshll.u32 %s808_s27, 4  ;;  %s427_s5 = int_to_ptr.vmem [resolvable:$true] %s426_s5 }
  0x58   :  { %491 = vmatpush3.msra.mxu0 %v151_v1  ;;  %526 = vmatpush3.msra.mxu1 %v134_v4  ;;  %v131_v9 = vld [vmem:[#allocation11 + $0x20] sm:$0xff]  ;;  %v146_v10 = vld [vmem:[#allocation13 + $0x50] sm:$0xff]  ;;  %v130_v11 = vld [vmem:[#allocation11 + $0x18] sm:$0xff]  ;;  %s703_s30 = scalar_lea.vmem %s427_s5, 128  ;;  %p708_p8 = scmp.lt.s32.totalorder %s427_s5, %s427_s5 }
  0x59   :  { %492 = vmatprep.subr.mxu0 %v806_v0  ;;  %527 = vmatprep.subr.mxu1 %v806_v0  ;;  %v145_v12 = vld [vmem:[#allocation13 + $0x48] sm:$0xff]  ;;  %v129_v13 = vld [vmem:[#allocation11 + $0x10] sm:$0xff]  ;;  %v144_v14 = vld [vmem:[#allocation13 + $0x40] sm:$0xff]  ;;  %p704_p7 = scmp.ne.s32.totalorder %s427_s5, %s703_s30  ;;  %p709_p9 = scmp.lt.s32.totalorder %s703_s30, %s703_s30 }
  0x5a   :  { %493 = vmatpush3.msra.mxu0 %v150_v2  ;;  %528 = vmatpush3.msra.mxu1 %v133_v5  ;;  %v128_v15 = vld [vmem:[#allocation11 + $0x8] sm:$0xff]  ;;  %v143_v16 = vld [vmem:[#allocation13 + $0x38] sm:$0xff]  ;;  %v127_v17 = vld [vmem:[#allocation11] sm:$0xff] }
  0x5b   :  { %494 = vmatprep.subr.mxu0 %v806_v0  ;;  %529 = vmatprep.subr.mxu1 %v806_v0  ;;  %v126_v18 = vld [vmem:[#allocation2] sm:$0xff]  ;;  %v141_v20 = vld [vmem:[#allocation13 + $0x28] sm:$0xff]  ;;  %v140_v21 = vld [vmem:[#allocation13 + $0x20] sm:$0xff]  ;;  %p710_p10 = por %p709_p9, %p708_p8 }
  0x5c   :  { %495 = vmatpush3.msra.mxu0 %v149_v3  ;;  %530 = vmatpush3.msra.mxu1 %v132_v7  ;;  %v142_v19 = vld [vmem:[#allocation13 + $0x30] sm:$0xff]  ;;  %v139_v22 = vld [vmem:[#allocation13 + $0x18] sm:$0xff]  ;;  %v137_v24 = vld [vmem:[#allocation13 + $0x8] sm:$0xff] }
  0x5d   :  { %496 = vmatprep.subr.mxu0 %v806_v0  ;;  %531 = vmatprep.subr.mxu1 %v806_v0  ;;  %v138_v23 = vld [vmem:[#allocation13 + $0x10] sm:$0xff]  ;;  %v136_v25 = vld [vmem:[#allocation13] sm:$0xff]  ;;  %v135_v26 = vld [vmem:[#allocation5] sm:$0xff]  ;;  %p711_p11 = pnand %p710_p10, %p704_p7 }
  0x5e   :  { %497 = vmatpush3.msra.mxu0 %v148_v6  ;;  %532 = vmatpush3.msra.mxu1 %v131_v9  ;;  %v298_v27 = vld [vmem:[#allocation10] sm:$0xff]  ;;  %v299_v28 = vld [vmem:[#allocation10 + $0x8] sm:$0xff]  ;;  %v296_v36 = vld [vmem:[#allocation7] sm:$0xff] }
  0x5f   :  { %498 = vmatprep.subr.mxu0 %v806_v0  ;;  %533 = vmatprep.subr.mxu1 %v806_v0  ;;  %v454_v29 = vld [vmem:[%s983_s8] ss:$0 sm:$0xff]  ;;  %v455_v30 = vld [vmem:[%s983_s8 + $0x1] ss:$0 sm:$0xff]  ;;  %v456_v32 = vld [vmem:[%s983_s8 + $0x2] ss:$0 sm:$0xff] }
  0x60   :  { %499 = vmatpush3.msra.mxu0 %v147_v8  ;;  %534 = vmatpush3.msra.mxu1 %v130_v11  ;;  %v323_v31 = vmul.f32 %v454_v29, %v298_v27  ;;  %v457_v33 = vld [vmem:[%s983_s8 + $0x3] ss:$0 sm:$0xff]  ;;  %v324_v34 = vmul.f32 %v455_v30, %v299_v28  ;;  %v458_v37 = vld [vmem:[%s983_s8 + $0x4] ss:$0 sm:$0xff]  ;;  %v459_v38 = vld [vmem:[%s983_s8 + $0x5] ss:$0 sm:$0xff] }
  0x61   :  { %500 = vmatprep.subr.mxu0 %v806_v0  ;;  %535 = vmatprep.subr.mxu1 %v806_v0  ;;  %v353_v41 = vmul.f32 %v458_v37, %v298_v27  ;;  %v354_v42 = vmul.f32 %v459_v38, %v299_v28  ;;  %v297_v50 = vld [vmem:[#allocation8] sm:$0xff]  ;;  %v461_v51 = vld [vmem:[%s982_s7 + $0x2] ss:$0 sm:$0xff]  ;;  %v460_v53 = vld [vmem:[%s982_s7 + $0x1] ss:$0 sm:$0xff] }
  0x62   :  { %501 = vmatpush3.msra.mxu0 %v146_v10  ;;  %536 = vmatpush3.msra.mxu1 %v129_v13  ;;  %v337_v35 = vadd.f32 %v456_v32, %v323_v31  ;;  %v338_v39 = vadd.f32 %v457_v33, %v324_v34  ;;  %v369_v56 = vmul.f32 %v461_v51, %v297_v50 }
  0x63   :  { %502 = vmatprep.subr.mxu0 %v806_v0  ;;  %537 = vmatprep.subr.mxu1 %v806_v0 }
  0x64   :  { %503 = vmatpush3.msra.mxu0 %v145_v12  ;;  %538 = vmatpush3.msra.mxu1 %v128_v15  ;;  %v339_v40 = vmul.f32 %v337_v35, %v296_v36  ;;  %v340_v43 = vmul.f32 %v338_v39, %v296_v36 }
  0x65   :  { %504 = vmatprep.subr.mxu0 %v806_v0  ;;  %539 = vmatprep.subr.mxu1 %v806_v0 }
  0x66   :  { %505 = vmatpush3.msra.mxu0 %v144_v14  ;;  %540 = vmatpush3.msra.mxu1 %v127_v17  ;;  %v355_v44 = vadd.f32 %v353_v41, %v339_v40  ;;  %v356_v45 = vadd.f32 %v354_v42, %v340_v43 }
  0x67   :  { %506 = vmatprep.subr.mxu0 %v806_v0  ;;  %542 = vmatmul.mubr.msk.f32.vlgmr.msra.gmra.mxu1 %vm222_vm1, %v126_v18 }
  0x68   :  { %507 = vmatpush3.msra.mxu0 %v143_v16  ;;  %385 = vst [vmem:[#allocation17] sm:$0xff] %v355_v44  ;;  %v357_v46 = vadd.f32 %v356_v45, %v355_v44  ;;  %386 = vst [vmem:[#allocation17 + $0x8] sm:$0xff] %v356_v45 }
  0x69   :  { %508 = vmatprep.subr.mxu0 %v806_v0 }
  0x6a   :  { %509 = vmatpush3.msra.mxu0 %v142_v19 }
  0x6b   :  { %510 = vmatprep.subr.mxu0 %v806_v0 }
  0x6c   :  { %511 = vmatpush3.msra.mxu0 %v141_v20 }
  0x6d   :  { %512 = vmatprep.subr.mxu0 %v806_v0 }
  0x6e   :  { %513 = vmatpush3.msra.mxu0 %v140_v21 }
  0x6f   :  { %514 = vmatprep.subr.mxu0 %v806_v0 }
  0x70   :  { %515 = vmatpush3.msra.mxu0 %v139_v22 }
  0x71   :  { %516 = vmatprep.subr.mxu0 %v806_v0 }
  0x72   :  { %517 = vmatpush3.msra.mxu0 %v138_v23 }
  0x73   :  { %518 = vmatprep.subr.mxu0 %v806_v0 }
  0x74   :  { %519 = vmatpush3.msra.mxu0 %v137_v24 }
  0x75   :  { %520 = vmatprep.subr.mxu0 %v806_v0 }
  0x76   :  { %521 = vmatpush3.msra.mxu0 %v136_v25 }
  0x77   :  { %523 = vmatmul.mubr.f32.vlgmr.msra.gmra.mxu0 %v135_v26 }
 0x127   :  { %v292_v47 = vpop.f32.mrf.mxu1 }
 0x129   :  { %v543_v48 = vpop.f32.mrf.mxu1 }
 0x137   :  { %v218_v49 = vpop.f32.mrf.mxu0 }
 0x138   :  { %v293_v52 = vadd.f32 %v292_v47, %v218_v49 }
 0x139   :  { %v524_v54 = vpop.f32.mrf.mxu0 }
 0x13a   :  { %v358_v55 = vadd.f32 %v357_v46, %v293_v52  ;;  %387 = vst [vmem:[#allocation18] sm:$0xff] %v293_v52 }
 0x13b   :  { %714 = shalt.err (!%p711_p11)
}
 0x13c   :  { %429 = dma.vmem_to_hbm [thread:$0]  %s427_s5, 128, %s987_s12, [#allocation19]   ;;  %v364_v57 = vmul.f32 %v460_v53, %v358_v55  ;;  %v359_v58 = vmul.f32 %v297_v50, %v296_v36  ;;  %v462_v60 = vld [vmem:[%s982_s7] ss:$0 sm:$0xff] }
 0x13d   :  { %s809_s15 = smov [#allocation15]   ;;  %s810_s16 = smov [#allocation17]  }
 0x13e   :  { %s404_s2 = sshll.u32 %s809_s15, 4  ;;  %v370_v59 = vadd.f32 %v369_v56, %v364_v57  ;;  %s413_s4 = sshll.u32 %s810_s16, 4  ;;  %s405_s2 = int_to_ptr.vmem [resolvable:$true] %s404_s2  ;;  %s414_s4 = int_to_ptr.vmem [resolvable:$true] %s413_s4 }
 0x13f   :  { %s723_s19 = scalar_lea.vmem %s405_s2, 128  ;;  %p728_p13 = scmp.lt.s32.totalorder %s405_s2, %s405_s2 }
 0x140   :  { %v371_v61 = vsub.f32 %v370_v59, %v359_v58  ;;  %p724_p12 = scmp.ne.s32.totalorder %s405_s2, %s723_s19  ;;  %p729_p0 = scmp.lt.s32.totalorder %s723_s19, %s723_s19 }
 0x142   :  { %v376_v62 = vsub.f32 %v371_v61, %v462_v60  ;;  %384 = vst [vmem:[#allocation15] sm:$0xff] %v371_v61  ;;  %p730_p1 = por %p729_p0, %p728_p13 }
 0x144   :  { %p731_p2 = pnand %p730_p1, %p724_p12 }
 0x146   :  { %734 = shalt.err (!%p731_p2)
}
 0x147   :  { %407 = dma.vmem_to_hbm [thread:$0]  %s405_s2, 128, %s985_s10, [#allocation16]   ;;  %v463_v63 = vmul.f32 -1.442695, %v376_v62 }
 0x148   :  { %s743_s20 = scalar_lea.vmem %s414_s4, 256  ;;  %p748_p4 = scmp.lt.s32.totalorder %s414_s4, %s414_s4 }
 0x149   :  { %p744_p3 = scmp.ne.s32.totalorder %s414_s4, %s743_s20  ;;  %p749_p5 = scmp.lt.s32.totalorder %s743_s20, %s743_s20 }
 0x14b   :  { %p750_p6 = por %p749_p5, %p748_p4 }
 0x14d   :  { %p751_p7 = pnand %p750_p6, %p744_p3 }
 0x14f   :  { %754 = shalt.err (!%p751_p7)
}
 0x150   :  { %419 = dma.vmem_to_hbm [thread:$0]  %s414_s4, 256, %s986_s11, [#allocation16], %s801_s1, %s801_s1, %s802_s18   ;;  %559 = vpow2.f32 %v463_v63 }
 0x151   :  { %s811_s10 = smov [#allocation14]  }
 0x152   :  { %s394_s22 = sshll.u32 %s811_s10, 4  ;;  %s395_s22 = int_to_ptr.vmem [resolvable:$true] %s394_s22 }
 0x153   :  { %s763_s23 = scalar_lea.vmem %s395_s22, 128  ;;  %p768_p9 = scmp.lt.s32.totalorder %s395_s22, %s395_s22 }
 0x154   :  { %p764_p8 = scmp.ne.s32.totalorder %s395_s22, %s763_s23  ;;  %p769_p10 = scmp.lt.s32.totalorder %s763_s23, %s763_s23 }
 0x156   :  { %p770_p11 = por %p769_p10, %p768_p9 }
 0x158   :  { %p771_p12 = pnand %p770_p11, %p764_p8 }
 0x15d   :  { %v560_v0 = vpop.eup %559 }
 0x15e   :  { %v380_v1 = vadd.f32 1.0, %v560_v0 }
 0x160   :  { %561 = vrcp.f32 %v380_v1 }
 0x16d   :  { %v562_v2 = vpop.eup %561 }
 0x16e   :  { %383 = vst [vmem:[#allocation14] sm:$0xff] %v562_v2 }
 0x16f   :  { %774 = shalt.err (!%p771_p12)
}
 0x170   :  { %397 = dma.vmem_to_hbm [thread:$0]  %s395_s22, 128, %s984_s9, [#allocation4]  }
 0x171   :  { %791 = dma.done.wait [#allocation4], 128  }
 0x172   :  { %792 = vsyncadd [#allocation4], 4294967168 }
 0x173   :  { %793 = dma.done.wait [#allocation16], 384  }
 0x174   :  { %794 = vsyncadd [#allocation16], 4294966912 }
 0x175   :  { %795 = dma.done.wait [#allocation19], 128  }
 0x176   :  { %796 = vsyncadd [#allocation19], 4294967168 }
 0x177   :  { %442 = vsyncpa [#allocation3], 1 }
 0x178   :  { %443 = vsyncpa [#allocation6], 1 }
 0x179   :  { %444 = vsyncpa [#allocation9], 1 }
 0x17a   :  { %445 = vsyncpa [#allocation12], 1 }
 0x17b   :  { %446 = vsyncpa [#allocation4], 1 }
 0x17c   :  { %447 = vsyncpa [#allocation16], 1 }
 0x17d   :  { %448 = vsyncpa [#allocation19], 1 }

</bundles_post_ra>
